<compile_context>
chip_gen: v7x
topology: tpu7x:2x2x1
jax: 0.10.0
libtpu: 0.0.40
codegen_flags: <defaults>
</compile_context>

<pallas_src>
import functools

import jax
import jax.numpy as jnp
from jax import lax
from jax.experimental import pallas as pl
from jax.experimental.pallas import tpu as pltpu


# ----------------------------- Pallas kernel ------------------------------ #

def _affinity_attention_kernel(x_ref, q_ref, k_ref, wv_ref, bv_ref,
                               gs_ref, gc_ref, o_ref, pc_ref, *, n, n_pad, tq):
    t_idx = pl.program_id(1)

    x = x_ref[0]          # (C, N_pad)  bf16 — full spatial extent (keys / channel contraction)
    q = q_ref[0]          # (C8, TQ)    f32  — query rows for this tile
    k = k_ref[0]          # (C8, N_pad) f32
    gs = gs_ref[0, 0]     # SMEM scalars
    gc = gc_ref[0, 0]

    f32 = jnp.float32
    bf16 = jnp.bfloat16
    contract_first = (((0,), (0,)), ((), ()))   # contract dim 0 of both operands
    contract_last = (((1,), (1,)), ((), ()))    # contract dim 1 of both operands

    # ---- Channel-attention gram + softmax: identical for every query tile of this
    # ---- batch -> compute once at t == 0 and cache in VMEM scratch (t is "arbitrary").
    @pl.when(t_idx == 0)
    def _():
        aff_c = lax.dot_general(x, x, contract_last, preferred_element_type=f32)  # (C, C)
        # softmax(rowmax - aff) == normalized exp(rowmin - aff)
        pc = jnp.exp(jnp.min(aff_c, axis=-1, keepdims=True) - aff_c)
        pc = pc * pl.reciprocal(jnp.sum(pc, axis=-1, keepdims=True), approx=True)
        pc_ref[...] = pc.astype(pc_ref.dtype)

    # ---------------- Spatial attention (this query-row tile, all keys) ----------
    # scores[i, j] = q[:, i] . k[:, j]        -> (TQ, N_pad)
    s = lax.dot_general(q, k, contract_first, preferred_element_type=f32)
    if n_pad != n:  # static: mask padded key columns out of the softmax
        key_id = lax.broadcasted_iota(jnp.int32, s.shape, 1)
        s = jnp.where(key_id < n, s, -1e30)
    s = s - jnp.max(s, axis=-1, keepdims=True)
    p = jnp.exp(s)
    p = p * pl.reciprocal(jnp.sum(p, axis=-1, keepdims=True), approx=True)

    # Reordered value path: t = x contracted with p over keys (C, TQ), then
    # w_s = wv @ t. The value-conv bias folds in afterwards (softmax rows sum to 1).
    # TODO(synk): verify with pl.lower_as_mlir that the contract_last (rhs = p) form
    # lowers without a per-tile relayout of p; if it does, switch to transposed scores.
    t_blk = lax.dot_general(x, p.astype(bf16), contract_last,
                            preferred_element_type=f32)                    # (C, TQ)
    w_s = jnp.dot(wv_ref[...], t_blk.astype(bf16),
                  preferred_element_type=f32)                              # (C, TQ)
    w_s = w_s + bv_ref[...]                                                # (C, 1) bcast

    # ---------------- Channel attention applied to this tile's x columns ---------
    j = pl.multiple_of(t_idx * tq, tq)
    x_blk = x_ref[0, :, pl.ds(j, tq)]                                      # (C, TQ) bf16
    w_c = jnp.dot(pc_ref[...], x_blk, preferred_element_type=f32)          # (C, TQ)

    # ---------------- Fused residual: (gs*w_s + x) + (gc*w_c + x) ----------------
    o_ref[0] = (gs * w_s + gc * w_c + 2.0 * x_blk.astype(f32)).astype(o_ref.dtype)


# ------------------------------- JAX glue --------------------------------- #

def _conv_bn_relu(x, w, b, bn, padding):
    """Conv2d (NCHW/OIHW) + BatchNorm2d(eval) + ReLU."""
    y = lax.conv_general_dilated(x, w, (1, 1), padding,
                                 dimension_numbers=('NCHW', 'OIHW', 'NCHW'))
    y = y + b[None, :, None, None]
    mean, var, gamma, beta, eps = bn
    y = (y - mean[None, :, None, None]) / jnp.sqrt(var[None, :, None, None] + eps)
    y = y * gamma[None, :, None, None] + beta[None, :, None, None]
    return jnp.maximum(y, 0.0)


def affinity_attention(x, params, *, tq=256):
    B, C, H, W = x.shape
    N = H * W
    C8 = C // 8

    # query: Conv(1,3) pad (0,1); key: Conv(3,1) pad (1,0)  (both + BN + ReLU)
    q_feat = _conv_bn_relu(x, params['wq'], params['bq'], params['bn_q'],
                           padding=[(0, 0), (1, 1)])
    k_feat = _conv_bn_relu(x, params['wk'], params['bk'], params['bn_k'],
                           padding=[(1, 1), (0, 0)])

    # q/k stay f32 (contraction-starved QK matmul); x/wv go bf16 for the MXU.
    q = q_feat.reshape(B, C8, N).astype(jnp.float32)
    k = k_feat.reshape(B, C8, N).astype(jnp.float32)
    x_flat = x.reshape(B, C, N).astype(jnp.bfloat16)

    wv = params['wv'].reshape(C, C).astype(jnp.bfloat16)
    bv = params['bv'].reshape(C, 1).astype(jnp.float32)
    gs = params['gamma_s'].reshape(1, 1).astype(jnp.float32)
    gc = params['gamma_c'].reshape(1, 1).astype(jnp.float32)

    # Query-row tiling: tq is a lane multiple; pad N up to a tq multiple (padded
    # keys are masked inside the kernel, padded output columns sliced off here).
    tq = max(128, (min(tq, max(N, 128)) // 128) * 128)
    n_pad = tq * ((N + tq - 1) // tq)
    if n_pad != N:
        pad = [(0, 0), (0, 0), (0, n_pad - N)]
        x_flat = jnp.pad(x_flat, pad)
        q = jnp.pad(q, pad)
        k = jnp.pad(k, pad)
    nt = n_pad // tq

    # Rough VMEM budget (double-buffered inputs/outputs + pc scratch + temporaries),
    # clamped to [32 MiB, 64 MiB] so it is valid on v5e/v6e (128 MiB) and v7x (64 MiB).
    resident = 2 * (C * n_pad * 2 + C8 * n_pad * 4 + C8 * tq * 4
                    + C * C * 2 + C * 4 + C * tq * 4)
    temps = 4 * (3 * tq * n_pad + 6 * C * tq + 3 * C * C)
    vmem_limit = int(min(max(2 * (resident + temps), 32 * 1024 * 1024),
                         64 * 1024 * 1024))

    kernel = functools.partial(_affinity_attention_kernel, n=N, n_pad=n_pad, tq=tq)

    out_flat = pl.pallas_call(
        kernel,
        out_shape=jax.ShapeDtypeStruct((B, C, n_pad), x.dtype),
        grid_spec=pltpu.PrefetchScalarGridSpec(
            num_scalar_prefetch=0,
            grid=(B, nt),
            in_specs=[
                pl.BlockSpec((1, C, n_pad), lambda b, t: (b, 0, 0)),   # x (full, bf16)
                pl.BlockSpec((1, C8, tq), lambda b, t: (b, 0, t)),     # proj_query tile
                pl.BlockSpec((1, C8, n_pad), lambda b, t: (b, 0, 0)),  # proj_key (full)
                pl.BlockSpec((C, C), lambda b, t: (0, 0)),             # value weight
                pl.BlockSpec((C, 1), lambda b, t: (0, 0)),             # value bias
                pl.BlockSpec(memory_space=pltpu.MemorySpace.SMEM),     # gamma (spatial)
                pl.BlockSpec(memory_space=pltpu.MemorySpace.SMEM),     # gamma (channel)
            ],
            out_specs=pl.BlockSpec((1, C, tq), lambda b, t: (b, 0, t)),
            scratch_shapes=[pltpu.VMEM((C, C), jnp.bfloat16)],         # cached channel softmax
        ),
        # Batch axis parallel (maps onto v7x's 2 TCs); t axis MUST be arbitrary so the
        # pl.when(t == 0)-initialized pc scratch is valid on every core.
        compiler_params=pltpu.CompilerParams(
            dimension_semantics=("parallel", "arbitrary"),
            vmem_limit_bytes=vmem_limit),
    )(x_flat, q, k, wv, bv, gs, gc)

    return out_flat[:, :, :N].reshape(B, C, H, W)


# --------------------------- pure-JAX reference ---------------------------- #

def affinity_attention_ref(x, params):
    B, C, H, W = x.shape
    N = H * W
    hi = lax.Precision.HIGHEST

    # spatial attention block
    qf = _conv_bn_relu(x, params['wq'], params['bq'], params['bn_q'],
                       padding=[(0, 0), (1, 1)])
    kf = _conv_bn_relu(x, params['wk'], params['bk'], params['bn_k'],
                       padding=[(1, 1), (0, 0)])
    pq = jnp.transpose(qf.reshape(B, -1, N), (0, 2, 1))
    pk = kf.reshape(B, -1, N)
    aff = jnp.einsum('bnc,bcm->bnm', pq, pk, precision=hi)
    aff = jax.nn.softmax(aff, axis=-1)
    vf = lax.conv_general_dilated(x, params['wv'], (1, 1), [(0, 0), (0, 0)],
                                  dimension_numbers=('NCHW', 'OIHW', 'NCHW'))
    vf = vf + params['bv'][None, :, None, None]
    pv = vf.reshape(B, C, N)
    w_s = jnp.einsum('bcn,bmn->bcm', pv, aff, precision=hi)
    sab = params['gamma_s'] * w_s + x.reshape(B, C, N)

    # channel attention block
    xf = x.reshape(B, C, N)
    affc = jnp.einsum('bcn,bdn->bcd', xf, xf, precision=hi)
    affc = jnp.max(affc, axis=-1, keepdims=True) - affc
    affc = jax.nn.softmax(affc, axis=-1)
    w_c = jnp.einsum('bcd,bdn->bcn', affc, xf, precision=hi)
    cab = params['gamma_c'] * w_c + xf

    return (sab + cab).reshape(B, C, H, W)


# ---------------------------------- main ----------------------------------- #

if __name__ == "__main__":
    key = jax.random.PRNGKey(0)
    B, C, H, W = 2, 16, 16, 16          # in_channels must be >= 8 (C // 8 > 0)
    C8 = C // 8
    keys = jax.random.split(key, 8)

    x = 0.3 * jax.random.normal(keys[0], (B, C, H, W), dtype=jnp.float32)

    def uinit(k, shape, fan_in):
        bound = 1.0 / (float(fan_in) ** 0.5)
        return jax.random.uniform(k, shape, jnp.float32, -bound, bound)

    params = dict(
        # query: Conv2d(C, C//8, (1,3)), key: Conv2d(C, C//8, (3,1)), value: 1x1
        wq=uinit(keys[1], (C8, C, 1, 3), C * 3),
        bq=uinit(keys[2], (C8,), C * 3),
        wk=uinit(keys[3], (C8, C, 3, 1), C * 3),
        bk=uinit(keys[4], (C8,), C * 3),
        wv=uinit(keys[5], (C, C, 1, 1), C),
        bv=uinit(keys[6], (C,), C),
        # BatchNorm2d in eval mode with default stats (mean=0, var=1, w=1, b=0)
        bn_q=(jnp.zeros(C8), jnp.ones(C8), jnp.ones(C8), jnp.zeros(C8), 1e-5),
        bn_k=(jnp.zeros(C8), jnp.ones(C8), jnp.ones(C8), jnp.zeros(C8), 1e-5),
        # Module __init__ sets gamma = 0 (attention becomes a no-op); use
        # deterministic nonzero values so the kernel path is actually exercised.
        gamma_s=jnp.array(0.5, jnp.float32),
        gamma_c=jnp.array(0.3, jnp.float32),
    )

    # tq=128 -> two query tiles per batch: exercises the cached channel softmax
    # (pl.when(t==0) scratch) and the pl.ds column slice at a nonzero offset.
    out = affinity_attention(x, params, tq=128)
    out = jax.block_until_ready(out)

    ref = affinity_attention_ref(x, params)
    assert out.shape == (B, C, H, W)
    max_err = float(jnp.max(jnp.abs(out - ref)))
    assert max_err < 5e-2, f"max abs err too large: {max_err}"
    print("KERNEL_OK")
</pallas_src>

<mosaic_0001>
module attributes {stable_mosaic.version = 11 : i64} {
  func.func @_affinity_attention_kernel(%arg0: i32, %arg1: i32, %arg2: memref<1x16x256xbf16, #tpu.memory_space<vmem>>, %arg3: memref<1x2x128xf32, #tpu.memory_space<vmem>>, %arg4: memref<1x2x256xf32, #tpu.memory_space<vmem>>, %arg5: memref<16x16xbf16, #tpu.memory_space<vmem>>, %arg6: memref<16x1xf32, #tpu.memory_space<vmem>>, %arg7: memref<1x1xf32, #tpu.memory_space<smem>>, %arg8: memref<1x1xf32, #tpu.memory_space<smem>>, %arg9: memref<1x16x128xf32, #tpu.memory_space<vmem>>, %arg10: memref<16x16xbf16, #tpu.memory_space<vmem>>) attributes {dimension_semantics = [#tpu.dimension_semantics<parallel>, #tpu.dimension_semantics<arbitrary>], iteration_bounds = array<i64: 2, 2>, scalar_prefetch = 0 : i64, scratch_operands = 1 : i64, tpu.core_type = #tpu.core_type<tc>, window_params = [{transform_indices = @transform_0, window_bounds = array<i64: 1, 16, 256>}, {transform_indices = @transform_1, window_bounds = array<i64: 1, 2, 128>}, {transform_indices = @transform_2, window_bounds = array<i64: 1, 2, 256>}, {pipeline_mode = #tpu.pipeline_mode<synchronous>, transform_indices = @transform_3, window_bounds = array<i64: 16, 16>}, {pipeline_mode = #tpu.pipeline_mode<synchronous>, transform_indices = @transform_4, window_bounds = array<i64: 16, 1>}, {transform_indices = @transform_5, window_bounds = array<i64: 1, 1>}, {transform_indices = @transform_6, window_bounds = array<i64: 1, 1>}, {transform_indices = @transform_7, window_bounds = array<i64: 1, 16, 128>}]} {
    %c0 = arith.constant 0 : index
    %c0_0 = arith.constant 0 : index
    %c0_1 = arith.constant 0 : index
    %0 = vector.load %arg2[%c0, %c0_0, %c0_1] : memref<1x16x256xbf16, #tpu.memory_space<vmem>>, vector<1x16x256xbf16>
    %1 = vector.shape_cast %0 : vector<1x16x256xbf16> to vector<16x256xbf16>
    %c0_2 = arith.constant 0 : index
    %c0_3 = arith.constant 0 : index
    %c0_4 = arith.constant 0 : index
    %2 = vector.load %arg3[%c0_2, %c0_3, %c0_4] : memref<1x2x128xf32, #tpu.memory_space<vmem>>, vector<1x2x128xf32>
    %3 = vector.shape_cast %2 : vector<1x2x128xf32> to vector<2x128xf32>
    %c0_5 = arith.constant 0 : index
    %c0_6 = arith.constant 0 : index
    %c0_7 = arith.constant 0 : index
    %4 = vector.load %arg4[%c0_5, %c0_6, %c0_7] : memref<1x2x256xf32, #tpu.memory_space<vmem>>, vector<1x2x256xf32>
    %5 = vector.shape_cast %4 : vector<1x2x256xf32> to vector<2x256xf32>
    %c0_8 = arith.constant 0 : index
    %c0_9 = arith.constant 0 : index
    %6 = memref.load %arg7[%c0_8, %c0_9] : memref<1x1xf32, #tpu.memory_space<smem>>
    %c0_10 = arith.constant 0 : index
    %c0_11 = arith.constant 0 : index
    %7 = memref.load %arg8[%c0_10, %c0_11] : memref<1x1xf32, #tpu.memory_space<smem>>
    %c0_i32 = arith.constant 0 : i32
    %8 = arith.cmpi eq, %arg1, %c0_i32 : i32
    %9 = arith.extui %8 : i1 to i32
    %c0_i32_12 = arith.constant 0 : i32
    %10 = arith.cmpi ne, %9, %c0_i32_12 : i32
    scf.if %10 {
      %cst_30 = arith.constant dense<0.000000e+00> : vector<16x16xf32>
      %49 = tpu.matmul %1, %1, %cst_30 {dimension_numbers = #tpu.dot_dimension_numbers<[1], [1], [0], [0], [0, 0, 1, 0], [], []>} : vector<16x256xbf16>, vector<16x256xbf16>, vector<16x16xf32> -> vector<16x16xf32>
      %cst_31 = arith.constant dense<0x7F800000> : vector<16xf32>
      %50 = vector.multi_reduction <minimumf>, %49, %cst_31 [1] : vector<16x16xf32> to vector<16xf32>
      %51 = vector.shape_cast %50 : vector<16xf32> to vector<16x1xf32>
      %52 = vector.broadcast %51 : vector<16x1xf32> to vector<16x16xf32>
      %53 = arith.subf %52, %49 : vector<16x16xf32>
      %54 = math.exp %53 : vector<16x16xf32>
      %cst_32 = arith.constant dense<0.000000e+00> : vector<16xf32>
      %55 = vector.multi_reduction <add>, %54, %cst_32 [1] : vector<16x16xf32> to vector<16xf32>
      %56 = vector.shape_cast %55 : vector<16xf32> to vector<16x1xf32>
      %57 = tpu.reciprocal %56 {approx = true} : vector<16x1xf32> -> vector<16x1xf32>
      %58 = vector.broadcast %57 : vector<16x1xf32> to vector<16x16xf32>
      %59 = arith.mulf %54, %58 : vector<16x16xf32>
      %60 = arith.truncf %59 : vector<16x16xf32> to vector<16x16xbf16>
      %c0_33 = arith.constant 0 : index
      %c0_34 = arith.constant 0 : index
      %61 = vector.load %arg10[%c0_33, %c0_34] : memref<16x16xbf16, #tpu.memory_space<vmem>>, vector<16x16xbf16>
      tpu.vector_store %arg10[%c0_33, %c0_34], %60 {strides = array<i32>} : memref<16x16xbf16, #tpu.memory_space<vmem>>, vector<16x16xbf16>,
    } else {
    }
    %cst = arith.constant dense<0.000000e+00> : vector<128x256xf32>
    %11 = tpu.matmul %3, %5, %cst {dimension_numbers = #tpu.dot_dimension_numbers<[0], [0], [1], [1], [0, 1, 1, 1], [], []>} : vector<2x128xf32>, vector<2x256xf32>, vector<128x256xf32> -> vector<128x256xf32>
    %cst_13 = arith.constant dense<0xFF800000> : vector<128xf32>
    %12 = vector.multi_reduction <maximumf>, %11, %cst_13 [1] : vector<128x256xf32> to vector<128xf32>
    %13 = vector.shape_cast %12 : vector<128xf32> to vector<128x1xf32>
    %14 = vector.broadcast %13 : vector<128x1xf32> to vector<128x256xf32>
    %15 = arith.subf %11, %14 : vector<128x256xf32>
    %16 = math.exp %15 : vector<128x256xf32>
    %cst_14 = arith.constant dense<0.000000e+00> : vector<128xf32>
    %17 = vector.multi_reduction <add>, %16, %cst_14 [1] : vector<128x256xf32> to vector<128xf32>
    %18 = vector.shape_cast %17 : vector<128xf32> to vector<128x1xf32>
    %19 = tpu.reciprocal %18 {approx = true} : vector<128x1xf32> -> vector<128x1xf32>
    %20 = vector.broadcast %19 : vector<128x1xf32> to vector<128x256xf32>
    %21 = arith.mulf %16, %20 : vector<128x256xf32>
    %22 = arith.truncf %21 : vector<128x256xf32> to vector<128x256xbf16>
    %cst_15 = arith.constant dense<0.000000e+00> : vector<16x128xf32>
    %23 = tpu.matmul %1, %22, %cst_15 {dimension_numbers = #tpu.dot_dimension_numbers<[1], [1], [0], [0], [0, 0, 1, 0], [], []>} : vector<16x256xbf16>, vector<128x256xbf16>, vector<16x128xf32> -> vector<16x128xf32>
    %c0_16 = arith.constant 0 : index
    %c0_17 = arith.constant 0 : index
    %24 = vector.load %arg5[%c0_16, %c0_17] : memref<16x16xbf16, #tpu.memory_space<vmem>>, vector<16x16xbf16>
    %25 = arith.truncf %23 : vector<16x128xf32> to vector<16x128xbf16>
    %cst_18 = arith.constant dense<0.000000e+00> : vector<16x128xf32>
    %26 = tpu.matmul %24, %25, %cst_18 {dimension_numbers = #tpu.dot_dimension_numbers<[1], [0], [0], [1], [0, 0, 1, 1], [], []>} : vector<16x16xbf16>, vector<16x128xbf16>, vector<16x128xf32> -> vector<16x128xf32>
    %c0_19 = arith.constant 0 : index
    %c0_20 = arith.constant 0 : index
    %27 = vector.load %arg6[%c0_19, %c0_20] : memref<16x1xf32, #tpu.memory_space<vmem>>, vector<16x1xf32>
    %28 = vector.broadcast %27 : vector<16x1xf32> to vector<16x128xf32>
    %29 = arith.addf %26, %28 : vector<16x128xf32>
    %c128_i32 = arith.constant 128 : i32
    %30 = arith.muli %arg1, %c128_i32 : i32
    %31 = tpu.assume_multiple %30, 128 : i32
    %c0_21 = arith.constant 0 : index
    %c0_22 = arith.constant 0 : index
    %32 = arith.index_cast %31 : i32 to index
    %33 = vector.load %arg2[%c0_21, %c0_22, %32] : memref<1x16x256xbf16, #tpu.memory_space<vmem>>, vector<1x16x128xbf16>
    %34 = vector.shape_cast %33 : vector<1x16x128xbf16> to vector<16x128xbf16>
    %c0_23 = arith.constant 0 : index
    %c0_24 = arith.constant 0 : index
    %35 = vector.load %arg10[%c0_23, %c0_24] : memref<16x16xbf16, #tpu.memory_space<vmem>>, vector<16x16xbf16>
    %cst_25 = arith.constant dense<0.000000e+00> : vector<16x128xf32>
    %36 = tpu.matmul %35, %34, %cst_25 {dimension_numbers = #tpu.dot_dimension_numbers<[1], [0], [0], [1], [0, 0, 1, 1], [], []>} : vector<16x16xbf16>, vector<16x128xbf16>, vector<16x128xf32> -> vector<16x128xf32>
    %37 = vector.broadcast %6 : f32 to vector<16x128xf32>
    %38 = arith.mulf %37, %29 : vector<16x128xf32>
    %39 = vector.broadcast %7 : f32 to vector<16x128xf32>
    %40 = arith.mulf %39, %36 : vector<16x128xf32>
    %41 = arith.addf %38, %40 : vector<16x128xf32>
    %42 = arith.extf %34 : vector<16x128xbf16> to vector<16x128xf32>
    %cst_26 = arith.constant 2.000000e+00 : f32
    %43 = vector.broadcast %cst_26 : f32 to vector<16x128xf32>
    %44 = arith.mulf %43, %42 : vector<16x128xf32>
    %45 = arith.addf %41, %44 : vector<16x128xf32>
    %c0_27 = arith.constant 0 : index
    %c0_28 = arith.constant 0 : index
    %c0_29 = arith.constant 0 : index
    %46 = vector.load %arg9[%c0_27, %c0_28, %c0_29] : memref<1x16x128xf32, #tpu.memory_space<vmem>>, vector<1x16x128xf32>
    %47 = vector.shape_cast %46 : vector<1x16x128xf32> to vector<16x128xf32>
    %48 = vector.shape_cast %45 : vector<16x128xf32> to vector<1x16x128xf32>
    tpu.vector_store %arg9[%c0_27, %c0_28, %c0_29], %48 {strides = array<i32>} : memref<1x16x128xf32, #tpu.memory_space<vmem>>, vector<1x16x128xf32>,
    return
  }
  func.func @transform_0(%arg0: i32, %arg1: i32) -> (i32, i32, i32) {
    %c0_i32 = arith.constant 0 : i32
    %c0_i32_0 = arith.constant 0 : i32
    %c0_i32_1 = arith.constant 0 : i32
    return %arg0, %c0_i32, %c0_i32_0 : i32, i32, i32
  }
  func.func @transform_1(%arg0: i32, %arg1: i32) -> (i32, i32, i32) {
    %c0_i32 = arith.constant 0 : i32
    %c0_i32_0 = arith.constant 0 : i32
    return %arg0, %c0_i32, %arg1 : i32, i32, i32
  }
  func.func @transform_2(%arg0: i32, %arg1: i32) -> (i32, i32, i32) {
    %c0_i32 = arith.constant 0 : i32
    %c0_i32_0 = arith.constant 0 : i32
    %c0_i32_1 = arith.constant 0 : i32
    return %arg0, %c0_i32, %c0_i32_0 : i32, i32, i32
  }
  func.func @transform_3(%arg0: i32, %arg1: i32) -> (i32, i32) {
    %c0_i32 = arith.constant 0 : i32
    %c0_i32_0 = arith.constant 0 : i32
    %c0_i32_1 = arith.constant 0 : i32
    return %c0_i32, %c0_i32_0 : i32, i32
  }
  func.func @transform_4(%arg0: i32, %arg1: i32) -> (i32, i32) {
    %c0_i32 = arith.constant 0 : i32
    %c0_i32_0 = arith.constant 0 : i32
    %c0_i32_1 = arith.constant 0 : i32
    return %c0_i32, %c0_i32_0 : i32, i32
  }
  func.func @transform_5(%arg0: i32, %arg1: i32) -> (i32, i32) {
    %c0_i32 = arith.constant 0 : i32
    %c0_i32_0 = arith.constant 0 : i32
    %c0_i32_1 = arith.constant 0 : i32
    return %c0_i32, %c0_i32_0 : i32, i32
  }
  func.func @transform_6(%arg0: i32, %arg1: i32) -> (i32, i32) {
    %c0_i32 = arith.constant 0 : i32
    %c0_i32_0 = arith.constant 0 : i32
    %c0_i32_1 = arith.constant 0 : i32
    return %c0_i32, %c0_i32_0 : i32, i32
  }
  func.func @transform_7(%arg0: i32, %arg1: i32) -> (i32, i32, i32) {
    %c0_i32 = arith.constant 0 : i32
    %c0_i32_0 = arith.constant 0 : i32
    return %arg0, %c0_i32, %arg1 : i32, i32, i32
  }
}

</mosaic_0001>

<bundles_post_ra>
// kernel: tpu_custom_call.1
= control target key start
LH: loop header
LB: loop body
LE: loop exit
PB: predicated region body
PF: predicated region fallthrough
CT: control target
= control target key end

     0   :  { %s2355_s0 = inlined_call_operand.hbm [shape: bf16[2,16,256], index: 0, kind: input, shape index: {}]   ;;  %s2356_s1 = inlined_call_operand.vmem [shape: f32[2,2,256], index: 1, kind: input, shape index: {}]   ;;  %s2357_s2 = inlined_call_operand.vmem [shape: f32[2,2,256], index: 2, kind: input, shape index: {}]   ;;  %s2358_s3 = inlined_call_operand.vmem [shape: bf16[16,16], index: 3, kind: input, shape index: {}]   ;;  %s2359_s4 = inlined_call_operand.vmem [shape: f32[16,1], index: 4, kind: input, shape index: {}]   ;;  %s2360_s5 = inlined_call_operand.<no memory space> [shape: f32[1,1], index: 5, kind: input, shape index: {}]   ;;  %s2361_s6 = inlined_call_operand.<no memory space> [shape: f32[1,1], index: 6, kind: input, shape index: {}]   ;;  %s2362_s7 = inlined_call_operand.hbm [shape: f32[2,16,256], index: 7, kind: output, shape index: {}]  }
   0x1   :  { %2370 = sst [smem:[#allocation18_spill]] %s2355_s0 }
   0x2   :  { %12 = sst [smem:[#allocation3]] %s2360_s5 }
   0x3   :  { %13 = sst [smem:[#allocation4]] %s2361_s6 }
   0x4   :  { %14 = vsyncpa [#allocation6], 0 }
   0x5   :  { %16 = vsyncpa [#allocation6 + $0x1], 0 }
   0x6   :  { %17 = vsyncpa [#allocation7], 0 }
   0x7   :  { %19 = vsyncpa [#allocation7 + $0x1], 0  ;;  %s1781_s28 = smov 0   ;;  %s1783_s29 = smov 0  }
   0x8   :  { %s1785_s30 = smov 0   ;;  %s1787_s8 = smov 0  }
   0x9   :  { %s1789_s9 = smov 0   ;;  %s1791_s10 = smov 0  }
   0xa   :  { %s1793_s5 = smov 0   ;;  %s1795_s11 = smov 0  }
   0xb   :  { %s1797_s6 = smov 0   ;;  %s1799_s12 = smov 0  }
   0xc   :  { %s1801_s13 = smov 0  }
   0xd LB: > { %2371 = sst [smem:[#allocation11_spill]] %s1699_s9  ;;  %s1286_s14 = sadd.s32 4294967295, %s1723_s13   ;;  %s1723_s13 = sphi %s1801_s13, %s25_s13   ;;  %s1719_s12 = sphi %s1799_s12, %s2393_s12   ;;  %s1715_s6 = sphi %s1797_s6, %s2392_s6   ;;  %s1711_s11 = sphi %s1795_s11, %s2391_s11   ;;  %s1707_s5 = sphi %s1793_s5, %s2390_s5   ;;  %s1703_s10 = sphi %s1791_s10, %s2389_s10   ;;  %s1699_s9 = sphi %s1789_s9, %s2388_s9   ;;  %s1695_s8 = sphi %s1787_s8, %s2387_s8   ;;  %s1691_s30 = sphi %s1785_s30, %s2396_s30   ;;  %s1687_s29 = sphi %s1783_s29, %s2395_s29   ;;  %s1683_s28 = sphi %s1781_s28, %s2394_s28  }
   0xe   : > { %2372 = sst [smem:[#allocation12_spill]] %s1703_s10  ;;  %s1287_s15 = sadd.s32 4294967294, %s1723_s13  }
   0xf   : > { %2373 = sst [smem:[#allocation13_spill]] %s1715_s6  ;;  %s34_s16 = sadd.s32 1, %s1715_s6 }
  0x10   : > { %2374 = sst [smem:[#allocation14_spill]] %s1719_s12  ;;  %s37_s17 = sadd.s32 1, %s1719_s12 }
  0x11   : > { %p35_p0 = scmp.ge.s32.totalorder %s34_s16, 2  ;;  %s44_s18 = sadd.s32 1, %s1703_s10 }
  0x12   : > { %p51_p1 = scmp.ne.s32.totalorder %s1703_s10, %s1699_s9  ;;  %p52_p2 = scmp.eq.s32.totalorder %s1723_s13, 0 }
  0x13   : > { %s2398_s16 = smov (%p35_p0, %s34_s16), 0  ;;  %s2400_s17 = smov (!%p35_p0, %s37_s17), %s1719_s12 }
  0x14   : > { %2375 = sst [smem:[#allocation15_spill]] %s2398_s16  ;;  %p1845_p3 = por %p52_p2, %p51_p1 }
  0x15   : > { %p57_p4 = scmp.ne.s32.totalorder %s1699_s9, %s1695_s8  ;;  %p39_p5 = scmp.ge.s32.totalorder %s2400_s17, 2 }
  0x16   : > { %p58_p6 = scmp.eq.s32.totalorder %s1286_s14, 0  ;;  %s206_s20 = ssub.s32 %s1715_s6, %s2398_s16 }
  0x17   : > { %s210_s21 = sadd.s32 1, %s1691_s30  ;;  %s2402_s17 = smov (%p39_p5, %s2400_s17), 0 }
  0x18   : > { %2377 = sst [smem:[#allocation16_spill]] %s2402_s17  ;;  %p1855_p7 = por %p58_p6, %p57_p4 }
  0x19   : > { %p220_p8 = scmp.ne.s32.totalorder %s1691_s30, %s1687_s29  ;;  %s41_s23 = ssub.s32 %s1719_s12, %s2402_s17 }
  0x1a   : > { %p221_p9 = scmp.eq.s32.totalorder %s1286_s14, 3  ;;  %p42_p10 = scmp.eq.s32.totalorder %s41_s23, 0 }
  0x1b   : > { %s207_s24 = sor.u32 %s206_s20, %s41_s23  ;;  %p226_p13 = scmp.ne.s32.totalorder %s1687_s29, %s1683_s28 }
  0x1c   : > { %p208_p11 = scmp.eq.s32.totalorder %s207_s24, 0  ;;  %p1863_p12 = por %p221_p9, %p220_p8 }
  0x1d   : > { %s1868_s26 = scalar_select %p42_p10, %s1703_s10, %s44_s18  }
  0x1e   : > { %s2379_s25 = scalar_select %p1863_p12, 1, 0 }
  0x1f   : > { %2380 = sst [smem:[#allocation17_spill]] %s1868_s26  ;;  %p227_p0 = scmp.eq.s32.totalorder %s1287_s15, 3 }
  0x20   : > { %s1871_s27 = scalar_select %p208_p11, %s1691_s30, %s210_s21  }
  0x21   : > { %p1365_p1 = scmp.lt.s32.totalorder %s1723_s13, 4  ;;  %p1876_p2 = por %p227_p0, %p226_p13 }
  0x22   : > { %s259_s14 = sand.u32 1, %s1703_s10   ;;  %s1335_s23 = sshll.u32 %s1719_s12, 8 }
  0x23   : > { %s2381_s8 = scalar_select %p1876_p2, 1, 0 }
  0x24   : > { %s1290_s20 = sshll.u32 %s259_s14, 4  ;;  %s2382_s0 = sld [smem:[#allocation18_spill]] }
  0x25   : > { %s263_s18 = scalar_lea.vmem [#allocation5], %s1290_s20  ;;  %p1891_p4 = pnand %p1365_p1, %p1845_p3 }
  0x26   : > { %s270_s21 = sshll.u32 %s263_s18, 4  ;;  %s1896_s12 = scalar_lea.sflag [#allocation6], %s259_s14  ;;  %s1887_s21 = int_to_ptr.vmem [resolvable:$true] %s270_s21 }
  0x27   : > { %p1573_p8 = pneg %p1891_p4 }
  0x2a   : > { %s1885_s16 = scalar_lea.hbm %s2382_s0, %s1335_s23  ;;  %s1576_s19 = scalar_lea.hbm %s2382_s0, 512 }
  0x2b   : > { %s1571_s17 = scalar_lea.hbm %s1885_s16, 256  ;;  %p1577_p3 = scmp.lt.u32.totalorder %s1885_s16, %s2382_s0 }
  0x2c   : > { %p1572_p6 = scmp.ne.s32.totalorder %s1885_s16, %s1571_s17  ;;  %p1578_p11 = scmp.lt.u32.totalorder %s1576_s19, %s1571_s17 }
  0x2d   : > { %p1580_p0 = scmp.lt.u32.totalorder %s1571_s17, %s1885_s16 }
  0x2e   : > { %p1574_p9 = pnand %p1573_p8, %p1572_p6  ;;  %p1579_p13 = por %p1578_p11, %p1577_p3 }
  0x30   : > { %p1575_p10 = pneg %p1574_p9  ;;  %p1581_p1 = por %p1580_p0, %p1579_p13 }
  0x32   : > { %p1582_p5 = pnand %p1581_p1, %p1575_p10 }
  0x34   : > { %1585 = shalt.err (!%p1582_p5)
}
  0x35   : > { %s1586_s14 = scalar_lea.vmem %s1887_s21, 256  ;;  %s1725_s20 = smov [#allocation5]  }
  0x36   : > { %p1587_p6 = scmp.ne.s32.totalorder %s1887_s21, %s1586_s14  ;;  %s1591_s23 = sshll.u32 %s1725_s20, 4  ;;  %s1592_s23 = int_to_ptr.vmem [resolvable:$false] %s1591_s23 }
  0x37   : > { %s1593_s24 = scalar_lea.vmem %s1592_s23, 512  ;;  %p1594_p12 = scmp.lt.s32.totalorder %s1887_s21, %s1592_s23 }
  0x38   : > { %p1589_p9 = pnand %p1587_p6, %p1573_p8  ;;  %p1595_p3 = scmp.lt.s32.totalorder %s1593_s24, %s1586_s14 }
  0x3a   : > { %p1590_p2 = pneg %p1589_p9  ;;  %p1596_p11 = por %p1595_p3, %p1594_p12 }
  0x3c   : > { %p1597_p13 = pnand %p1596_p11, %p1590_p2 }
  0x3e   : > { %1600 = shalt.err (!%p1597_p13)
}
  0x3f   : > { %s1726_s17 = smov 128   ;;  %s1727_s19 = smov 8  }
  0x40   : > { %1360 = dma.hbm_to_vmem [thread:$0]  (!%p1891_p4), %s1885_s16, 256, %s1887_s21, %s1896_s12, %s1726_s17, %s1726_s17, %s1727_s19  }
  0x41   : > { %p297_p5 = scmp.lt.s32.totalorder %s1723_s13, 5  ;;  %p2384_p8 = scmp.ge.s32.totalorder %s1723_s13, 1 }
  0x43   : > { %p298_p10 = pnand %p2384_p8, %p297_p5 }
  0x44   : > { %s303_s18 = sand.u32 (!%p298_p10), 1, %s1699_s9  }
  0x45   : > { %301 = sbr.rel (%p298_p10) target bundleno = 1815 (0x717), region = 48  ;;  %s1294_s14 = sshll.u32 (!%p298_p10), %s303_s18, 4 }
  0x46   : > { %s304_s20 = scalar_lea.sflag (!%p298_p10), [#allocation6], %s303_s18  ;;  %s1928_s23 = scalar_lea.vmem (!%p298_p10), [#allocation5], %s1294_s14 }
  0x4c   : > { %1674 = dma.done.wait (%p1855_p7), %s304_s20, 256  }
  0x4d   : > { %1676 = vsyncadd (%p1855_p7), %s304_s20, 4294967040  ;;  %p351_p12 = scmp.lt.s32.totalorder %s1711_s11, 1  ;;  %p353_p2 = scmp.lt.s32.totalorder %s1707_s5, 1  ;;  %v1950_v0 = vld [vmem:[%s1928_s23] sm:$0xff]  ;;  %v1953_v1 = vld [vmem:[%s1928_s23 + $0x8] sm:$0xff] }
  0x4e   : > { %s1936_s12 = sld [smem:[#allocation3]]  ;;  %s348_s0 = sand.u32 1, %s1687_s29  }
  0x4f   : > { %s1938_s16 = sld [smem:[#allocation4]]  ;;  %s1295_s9 = sshll.u32 %s348_s0, 4 }
  0x50   : > { %s352_s21 = scalar_select %p351_p12, %s1711_s11, 1 }
  0x51   : > { %s354_s15 = scalar_select %p353_p2, %s1707_s5, 1 }
  0x52   : > { %s1296_s24 = sshll.u32 %s352_s21, 1  ;;  %s1336_s17 = sshll.u32 %s352_s21, 2 }
  0x53   : > { %s356_s22 = sadd.s32 %s1296_s24, %s354_s15  ;;  %s363_s14 = scalar_lea.vmem %s2357_s2, %s1336_s17 }
  0x54   : > { %s1297_s20 = sshll.u32 %s356_s22, 1  ;;  %v1303_v2 = vld.sshfl [vmem:[%s363_s14] sm:$0x33 pattern:$0x76325410]  ;;  %s1957_s21 = scalar_lea.vmem [#allocation8], %s1295_s9 }
  0x55   : > { %s358_s10 = scalar_lea.vmem %s2356_s1, %s1297_s20  ;;  %p1300_p7 = scmp.ne.s32.totalorder %s1707_s5, 0 }
  0x56   : > { %v367_v3 = vld [vmem:[%s358_s10] sm:$0x3]  ;;  %v1302_v4 = vcombine.high (!%p1300_p7), %v1950_v0, %v1953_v1  ;;  %v1301_v5 = vcombine.low (!%p1300_p7), %v1950_v0, %v1953_v1  ;;  %vm426_vm0 = vcmask (!%p1300_p7), 130048  }
  0x57   : > { %374 = sbr.rel (%p1300_p7) target bundleno = 629 (0x275), region = 56 }
  0x58   : > { %385 = vmatprep.subr.bf16.mxu0 (!%p1300_p7), %v1302_v4  ;;  %417 = vmatprep.mubr.bf16.mxu0 (!%p1300_p7), %v1302_v4 }
  0x59   : > { %386 = vmatpush1.bf16.xpose.msra.mxu0 (!%p1300_p7), %v1301_v5 }
  0x60   : > { %418 = vmatmul.mubr.bf16.vlgmr.msra.gmra.mrb[0].mxu0 %v1301_v5 }
 0x133   : > { %v419_v6 = vpop.f32.mrb[0].mxu0 }
 0x134   : > { %v421_v7 = vpop.f32.mrb[1].mxu0  ;;  %v427_v8 = vsel %vm426_vm0, %v419_v6, inf }
 0x135   : > { %428 = vmin.xlane.f32.xlu0 %v427_v8  ;;  %v422_v9 = vpop.f32.mrb[2].mxu0 }
 0x136   : > { %v424_v10 = vpop.f32.mrb[3].mxu0  ;;  %v430_v11 = vsel %vm426_vm0, %v422_v9, inf }
 0x139   : > { %431 = vmin.xlane.f32.xlu0 %v430_v11 }
 0x1c2   : > { %v429_v12 = vpop.xlane.xlu0 %428 }
 0x1c3   : > { %v433_v13 = vsub.f32 %v429_v12, %v419_v6 }
 0x1c5   : > { %v435_v14 = vmul.f32 1.442695, %v433_v13 }
 0x1c6   : > { %v432_v15 = vpop.xlane.xlu0 %431 }
 0x1c7   : > { %1463 = vpow2.f32 %v435_v14  ;;  %v434_v16 = vsub.f32 %v432_v15, %v422_v9 }
 0x1c9   : > { %v437_v17 = vmul.f32 1.442695, %v434_v16 }
 0x1cb   : > { %1465 = vpow2.f32 %v437_v17 }
 0x1d1   : > { %v1464_v18 = vpop.eup %1463 }
 0x1d2   : > { %v439_v19 = vsel %vm426_vm0, %v1464_v18, 0.0 }
 0x1d3   : > { %440 = vadd.xlane.f32.xlu1 %v439_v19 }
 0x1d5   : > { %v1466_v20 = vpop.eup %1465 }
 0x1d6   : > { %v442_v21 = vsel %vm426_vm0, %v1466_v20, 0.0 }
 0x1d7   : > { %443 = vadd.xlane.f32.xlu1 %v442_v21 }
 0x260   : > { %v441_v22 = vpop.xlane.xlu1 %440 }
 0x261   : > { %1467 = vrcp.f32 %v441_v22 }
 0x264   : > { %v444_v23 = vpop.xlane.xlu1 %443 }
 0x265   : > { %1469 = vrcp.f32 %v444_v23 }
 0x26b   : > { %v1468_v24 = vpop.eup %1467 }
 0x26c   : > { %v447_v26 = vmul.f32 %v1468_v24, %v1464_v18 }
 0x26f   : > { %v1470_v25 = vpop.eup %1469 }
 0x270   : > { %v448_v27 = vmul.f32 %v1470_v25, %v1466_v20 }
 0x272   : > { %v449_v28 = vpack.c.bf16 %v448_v27, %v447_v26 }
 0x274   : > { %450 = vst.msk [vmem:[#allocation2] sm:$0xff] %vm426_vm0, %v449_v28 }
 0x275 PF: > { %451 = vxpose.xlu0.b32.start.end [1/1] (short) %v367_v3, 128  ;;  %v491_v29 = vcombine.high %v1303_v2, %v1303_v2  ;;  %vm541_vm1 = vcmask 1041408   ;;  %v1728_v30 = vmov 0.0   ;;  %vm492_vm2 = vcmask 15360   ;;  %s1326_s9 = sshll.u32 %s1707_s5, 7  ;;  %s1331_s18 = sshll.u32 %s1711_s11, 2 }
 0x276   : > { %610 = vmatprep.mubr.f32.mxu0 %v1728_v30  ;;  %s1080_s10 = sshra.s32 %s1326_s9, 7  ;;  %vm1034_vm3 = vcmask 130048   ;;  %vm1729_vm4 = vmmov 0   ;;  %s1165_s14 = sadd.s32 %s1707_s5, %s1331_s18 }
 0x277   : > { %1304 = vmatprep.subr.msk.mxu0 %vm541_vm1, %v491_v29  ;;  %s1327_s6 = sshll.u32 %s1080_s10, 2  ;;  %s1168_s11 = sshll.u32 %s1957_s21, 4  ;;  %s2288_s11 = int_to_ptr.vmem [resolvable:$true] %s1168_s11 }
 0x278   : > { %1305 = vmatpush1.msk.msra.mxu0 %vm541_vm1, %v1303_v2  ;;  %s1083_s26 = scalar_lea.vmem %s1928_s23, %s1327_s6 [#allocation5]  ;;  %s2294_s9 = scalar_lea.sflag [#allocation7], %s348_s0 }
 0x279   : > { %1341 = vmatprep.subr.bf16.mxu0 %v1728_v30  ;;  %s1601_s10 = scalar_lea.vmem %s2288_s11, 256  ;;  %p2385_p0 = scmp.ne.s32.totalorder %s2379_s25, 0 }
 0x27a   : > { %p1602_p4 = scmp.ne.s32.totalorder %s2288_s11, %s1601_s10  ;;  %s1731_s6 = smov [#allocation8]  }
 0x27c   : > { %p1603_p1 = pnand %p1602_p4, %p2385_p0 }
 0x27e   : > { %p1604_p6 = pneg %p1603_p1 }
 0x2f5   : > { %v467_v31 = vpop.trf.xlu0 }
 0x2f6   : > { %1306 = vmatmul.mubr.msk.f32.vlgmr.msra.gmra.mrb[0].mxu0 %vm492_vm2, %v467_v31 }
 0x2f7   : > { %616 = vmatprep.mubr.f32.mxu0 %v1728_v30 }
 0x2f9   : > { %v468_v32 = vpop.trf.xlu0 }
 0x2fa   : > { %1307 = vmatmul.mubr.msk.f32.gmra.mrb[2].mxu0 %vm492_vm2, %v468_v32 }
 0x2fb   : > { %622 = vmatprep.mubr.f32.mxu0 %v1728_v30 }
 0x2fd   : > { %v469_v33 = vpop.trf.xlu0 }
 0x2fe   : > { %1308 = vmatmul.mubr.msk.f32.gmra.mrb[4].mxu0 %vm492_vm2, %v469_v33 }
 0x2ff   : > { %628 = vmatprep.mubr.f32.mxu0 %v1728_v30 }
 0x301   : > { %v470_v34 = vpop.trf.xlu0 }
 0x302   : > { %1309 = vmatmul.mubr.msk.f32.gmra.mrb[6].mxu0 %vm492_vm2, %v470_v34 }
 0x303   : > { %634 = vmatprep.mubr.f32.mxu0 %v1728_v30 }
 0x305   : > { %v471_v35 = vpop.trf.xlu0 }
 0x306   : > { %1310 = vmatmul.mubr.msk.f32.gmra.mrb[8].mxu0 %vm492_vm2, %v471_v35 }
 0x307   : > { %640 = vmatprep.mubr.f32.mxu0 %v1728_v30 }
 0x309   : > { %v472_v36 = vpop.trf.xlu0 }
 0x30a   : > { %1311 = vmatmul.mubr.msk.f32.gmra.mrb[10].mxu0 %vm492_vm2, %v472_v36 }
 0x30b   : > { %646 = vmatprep.mubr.f32.mxu0 %v1728_v30 }
 0x30d   : > { %v473_v37 = vpop.trf.xlu0 }
 0x30e   : > { %1312 = vmatmul.mubr.msk.f32.gmra.mrb[12].mxu0 %vm492_vm2, %v473_v37 }
 0x30f   : > { %652 = vmatprep.mubr.f32.mxu0 %v1728_v30 }
 0x311   : > { %v474_v38 = vpop.trf.xlu0 }
 0x312   : > { %1313 = vmatmul.mubr.msk.f32.gmra.mrb[14].mxu0 %vm492_vm2, %v474_v38 }
 0x313   : > { %658 = vmatprep.mubr.f32.mxu0 %v1728_v30 }
 0x315   : > { %v475_v39 = vpop.trf.xlu0 }
 0x316   : > { %1314 = vmatmul.mubr.msk.f32.gmra.mrb[16].mxu0 %vm492_vm2, %v475_v39 }
 0x317   : > { %664 = vmatprep.mubr.f32.mxu0 %v1728_v30 }
 0x319   : > { %v476_v40 = vpop.trf.xlu0 }
 0x31a   : > { %1315 = vmatmul.mubr.msk.f32.gmra.mrb[18].mxu0 %vm492_vm2, %v476_v40 }
 0x31b   : > { %670 = vmatprep.mubr.f32.mxu0 %v1728_v30 }
 0x31d   : > { %v477_v41 = vpop.trf.xlu0 }
 0x31e   : > { %1316 = vmatmul.mubr.msk.f32.gmra.mrb[20].mxu0 %vm492_vm2, %v477_v41 }
 0x31f   : > { %676 = vmatprep.mubr.f32.mxu0 %v1728_v30 }
 0x321   : > { %v478_v42 = vpop.trf.xlu0 }
 0x322   : > { %1317 = vmatmul.mubr.msk.f32.gmra.mrb[22].mxu0 %vm492_vm2, %v478_v42 }
 0x323   : > { %682 = vmatprep.mubr.f32.mxu0 %v1728_v30 }
 0x325   : > { %v479_v43 = vpop.trf.xlu0 }
 0x326   : > { %1318 = vmatmul.mubr.msk.f32.gmra.mrb[24].mxu0 %vm492_vm2, %v479_v43 }
 0x327   : > { %688 = vmatprep.mubr.f32.mxu0 %v1728_v30 }
 0x329   : > { %v480_v44 = vpop.trf.xlu0 }
 0x32a   : > { %1319 = vmatmul.mubr.msk.f32.gmra.mrb[26].mxu0 %vm492_vm2, %v480_v44 }
 0x32b   : > { %694 = vmatprep.mubr.f32.mxu0 %v1728_v30 }
 0x32d   : > { %v481_v45 = vpop.trf.xlu0 }
 0x32e   : > { %1320 = vmatmul.mubr.msk.f32.gmra.mrb[28].mxu0 %vm492_vm2, %v481_v45 }
 0x32f   : > { %700 = vmatprep.mubr.f32.mxu0 %v1728_v30 }
 0x331   : > { %v482_v46 = vpop.trf.xlu0 }
 0x332   : > { %1321 = vmatmul.mubr.msk.f32.gmra.mrb[30].mxu0 %vm492_vm2, %v482_v46 }
 0x333   : > { %1343 = vmatprep.mubr.msk.bf16.mxu0 %vm1729_vm4, %v1728_v30 }
 0x3c9   : > { %v2002_v47 = vpop.f32.mrb[0].mxu0 }
 0x3ca   : > { %v2004_v48 = vpop.f32.mrb[1].mxu0 }
 0x3cb   : > { %v707_v49 = vmax.f32 %v2002_v47, %v2004_v48 }
 0x3cd   : > { %708 = vmax.xlane.f32.xlu0 %v707_v49  ;;  %v2008_v50 = vpop.f32.mrb[2].mxu0 }
 0x3ce   : > { %v2010_v51 = vpop.f32.mrb[3].mxu0 }
 0x3cf   : > { %v710_v52 = vmax.f32 %v2008_v50, %v2010_v51 }
 0x3d1   : > { %711 = vmax.xlane.f32.xlu1 %v710_v52  ;;  %v2014_v53 = vpop.f32.mrb[4].mxu0 }
 0x3d2   : > { %v2016_v54 = vpop.f32.mrb[5].mxu0 }
 0x3d3   : > { %v713_v55 = vmax.f32 %v2014_v53, %v2016_v54 }
 0x3d5   : > { %714 = vmax.xlane.f32.xlu1 %v713_v55  ;;  %v2020_v56 = vpop.f32.mrb[6].mxu0 }
 0x3d6   : > { %v2022_v57 = vpop.f32.mrb[7].mxu0 }
 0x3d7   : > { %v716_v58 = vmax.f32 %v2020_v56, %v2022_v57 }
 0x3d9   : > { %717 = vmax.xlane.f32.xlu1 %v716_v58  ;;  %v2026_v59 = vpop.f32.mrb[8].mxu0 }
 0x3da   : > { %v2028_v60 = vpop.f32.mrb[9].mxu0 }
 0x3db   : > { %v719_v61 = vmax.f32 %v2026_v59, %v2028_v60 }
 0x3dd   : > { %720 = vmax.xlane.f32.xlu1 %v719_v61  ;;  %v2032_v62 = vpop.f32.mrb[10].mxu0 }
 0x3de   : > { %v2034_v63 = vpop.f32.mrb[11].mxu0 }
 0x3df   : > { %v722_v2 = vmax.f32 %v2032_v62, %v2034_v63 }
 0x3e1   : > { %723 = vmax.xlane.f32.xlu1 %v722_v2  ;;  %v2038_v3 = vpop.f32.mrb[12].mxu0 }
 0x3e2   : > { %v2040_v4 = vpop.f32.mrb[13].mxu0 }
 0x3e3   : > { %v725_v5 = vmax.f32 %v2038_v3, %v2040_v4 }
 0x3e5   : > { %726 = vmax.xlane.f32.xlu1 %v725_v5  ;;  %v2044_v6 = vpop.f32.mrb[14].mxu0 }
 0x3e6   : > { %v2046_v7 = vpop.f32.mrb[15].mxu0 }
 0x3e7   : > { %v728_v8 = vmax.f32 %v2044_v6, %v2046_v7 }
 0x3e9   : > { %729 = vmax.xlane.f32.xlu1 %v728_v8  ;;  %v2050_v9 = vpop.f32.mrb[16].mxu0 }
 0x3ea   : > { %v2052_v10 = vpop.f32.mrb[17].mxu0 }
 0x3eb   : > { %v731_v11 = vmax.f32 %v2050_v9, %v2052_v10 }
 0x3ed   : > { %732 = vmax.xlane.f32.xlu1 %v731_v11  ;;  %v2056_v12 = vpop.f32.mrb[18].mxu0 }
 0x3ee   : > { %v2058_v13 = vpop.f32.mrb[19].mxu0 }
 0x3ef   : > { %v734_v14 = vmax.f32 %v2056_v12, %v2058_v13 }
 0x3f1   : > { %735 = vmax.xlane.f32.xlu1 %v734_v14  ;;  %v2062_v15 = vpop.f32.mrb[20].mxu0 }
 0x3f2   : > { %v2064_v16 = vpop.f32.mrb[21].mxu0 }
 0x3f3   : > { %v737_v17 = vmax.f32 %v2062_v15, %v2064_v16 }
 0x3f5   : > { %738 = vmax.xlane.f32.xlu1 %v737_v17  ;;  %v2068_v18 = vpop.f32.mrb[22].mxu0 }
 0x3f6   : > { %v2070_v19 = vpop.f32.mrb[23].mxu0 }
 0x3f7   : > { %v740_v20 = vmax.f32 %v2068_v18, %v2070_v19 }
 0x3f9   : > { %741 = vmax.xlane.f32.xlu1 %v740_v20  ;;  %v2074_v21 = vpop.f32.mrb[24].mxu0 }
 0x3fa   : > { %v2076_v22 = vpop.f32.mrb[25].mxu0 }
 0x3fb   : > { %v743_v23 = vmax.f32 %v2074_v21, %v2076_v22 }
 0x3fd   : > { %744 = vmax.xlane.f32.xlu1 %v743_v23  ;;  %v2080_v24 = vpop.f32.mrb[26].mxu0 }
 0x3fe   : > { %v2082_v25 = vpop.f32.mrb[27].mxu0 }
 0x3ff   : > { %v746_v26 = vmax.f32 %v2080_v24, %v2082_v25 }
 0x401   : > { %747 = vmax.xlane.f32.xlu1 %v746_v26  ;;  %v2086_v27 = vpop.f32.mrb[28].mxu0 }
 0x402   : > { %v2088_v28 = vpop.f32.mrb[29].mxu0 }
 0x403   : > { %v749_v29 = vmax.f32 %v2086_v27, %v2088_v28 }
 0x405   : > { %750 = vmax.xlane.f32.xlu1 %v749_v29  ;;  %v2092_v31 = vpop.f32.mrb[30].mxu0 }
 0x406   : > { %v2094_v32 = vpop.f32.mrb[31].mxu0 }
 0x407   : > { %v752_v33 = vmax.f32 %v2092_v31, %v2094_v32 }
 0x409   : > { %753 = vmax.xlane.f32.xlu1 %v752_v33 }
 0x45a   : > { %v709_v34 = vpop.xlane.xlu0 %708 }
 0x45b   : > { %v755_v35 = vsub.f32 %v2002_v47, %v709_v34  ;;  %v756_v36 = vsub.f32 %v2004_v48, %v709_v34 }
 0x45d   : > { %v787_v37 = vmul.f32 1.442695, %v755_v35  ;;  %v789_v38 = vmul.f32 1.442695, %v756_v36 }
 0x45e   : > { %v712_v39 = vpop.xlane.xlu1 %711 }
 0x45f   : > { %1475 = vpow2.f32 %v787_v37  ;;  %v757_v40 = vsub.f32 %v2008_v50, %v712_v39  ;;  %v758_v41 = vsub.f32 %v2010_v51, %v712_v39 }
 0x460   : > { %1477 = vpow2.f32 %v789_v38 }
 0x461   : > { %v791_v42 = vmul.f32 1.442695, %v757_v40  ;;  %v793_v43 = vmul.f32 1.442695, %v758_v41 }
 0x462   : > { %v715_v44 = vpop.xlane.xlu1 %714 }
 0x463   : > { %1479 = vpow2.f32 %v791_v42  ;;  %v759_v45 = vsub.f32 %v2014_v53, %v715_v44  ;;  %v760_v46 = vsub.f32 %v2016_v54, %v715_v44 }
 0x464   : > { %1481 = vpow2.f32 %v793_v43 }
 0x465   : > { %v795_v47 = vmul.f32 1.442695, %v759_v45  ;;  %v797_v48 = vmul.f32 1.442695, %v760_v46 }
 0x466   : > { %v718_v49 = vpop.xlane.xlu1 %717 }
 0x467   : > { %1483 = vpow2.f32 %v795_v47  ;;  %v761_v52 = vsub.f32 %v2020_v56, %v718_v49  ;;  %v762_v50 = vsub.f32 %v2022_v57, %v718_v49 }
 0x468   : > { %1485 = vpow2.f32 %v797_v48 }
 0x469   : > { %v2106_v51 = vpop.eup %1475  ;;  %v799_v55 = vmul.f32 1.442695, %v761_v52  ;;  %v801_v58 = vmul.f32 1.442695, %v762_v50 }
 0x46a   : > { %v2108_v61 = vpop.eup %1477  ;;  %v721_v2 = vpop.xlane.xlu1 %720 }
 0x46b   : > { %1487 = vpow2.f32 %v799_v55  ;;  %v763_v53 = vsub.f32 %v2026_v59, %v721_v2  ;;  %v764_v54 = vsub.f32 %v2028_v60, %v721_v2  ;;  %v851_v5 = vadd.f32 %v2108_v61, %v2106_v51 }
 0x46c   : > { %1489 = vpow2.f32 %v801_v58 }
 0x46d   : > { %v2114_v56 = vpop.eup %1479  ;;  %v803_v57 = vmul.f32 1.442695, %v763_v53  ;;  %v805_v8 = vmul.f32 1.442695, %v764_v54  ;;  %852 = vadd.xlane.f32.xlu1 %v851_v5 }
 0x46e   : > { %v2116_v11 = vpop.eup %1481  ;;  %v724_v14 = vpop.xlane.xlu1 %723 }
 0x46f   : > { %1491 = vpow2.f32 %v803_v57  ;;  %v765_v17 = vsub.f32 %v2032_v62, %v724_v14  ;;  %v766_v20 = vsub.f32 %v2034_v63, %v724_v14  ;;  %v854_v59 = vadd.f32 %v2116_v11, %v2114_v56 }
 0x470   : > { %1493 = vpow2.f32 %v805_v8 }
 0x471   : > { %v2122_v60 = vpop.eup %1483  ;;  %v807_v23 = vmul.f32 1.442695, %v765_v17  ;;  %v809_v26 = vmul.f32 1.442695, %v766_v20  ;;  %855 = vadd.xlane.f32.xlu1 %v854_v59 }
 0x472   : > { %v2124_v29 = vpop.eup %1485  ;;  %v727_v33 = vpop.xlane.xlu1 %726 }
 0x473   : > { %1495 = vpow2.f32 %v807_v23  ;;  %v767_v34 = vsub.f32 %v2038_v3, %v727_v33  ;;  %v768_v35 = vsub.f32 %v2040_v4, %v727_v33  ;;  %v857_v62 = vadd.f32 %v2124_v29, %v2122_v60 }
 0x474   : > { %1497 = vpow2.f32 %v809_v26 }
 0x475   : > { %v2130_v63 = vpop.eup %1487  ;;  %v811_v36 = vmul.f32 1.442695, %v767_v34  ;;  %v813_v37 = vmul.f32 1.442695, %v768_v35  ;;  %858 = vadd.xlane.f32.xlu1 %v857_v62 }
 0x476   : > { %v2132_v38 = vpop.eup %1489  ;;  %v730_v39 = vpop.xlane.xlu1 %729 }
 0x477   : > { %1499 = vpow2.f32 %v811_v36  ;;  %v769_v40 = vsub.f32 %v2044_v6, %v730_v39  ;;  %v770_v41 = vsub.f32 %v2046_v7, %v730_v39  ;;  %v860_v3 = vadd.f32 %v2132_v38, %v2130_v63 }
 0x478   : > { %1501 = vpow2.f32 %v813_v37 }
 0x479   : > { %v2138_v4 = vpop.eup %1491  ;;  %v815_v42 = vmul.f32 1.442695, %v769_v40  ;;  %v817_v43 = vmul.f32 1.442695, %v770_v41  ;;  %861 = vadd.xlane.f32.xlu1 %v860_v3 }
 0x47a   : > { %v2140_v44 = vpop.eup %1493  ;;  %v733_v45 = vpop.xlane.xlu1 %732 }
 0x47b   : > { %1503 = vpow2.f32 %v815_v42  ;;  %v771_v46 = vsub.f32 %v2050_v9, %v733_v45  ;;  %v772_v47 = vsub.f32 %v2052_v10, %v733_v45  ;;  %v863_v6 = vadd.f32 %v2140_v44, %v2138_v4 }
 0x47c   : > { %1505 = vpow2.f32 %v817_v43 }
 0x47d   : > { %v2146_v7 = vpop.eup %1495  ;;  %v819_v48 = vmul.f32 1.442695, %v771_v46  ;;  %v821_v49 = vmul.f32 1.442695, %v772_v47  ;;  %864 = vadd.xlane.f32.xlu1 %v863_v6 }
 0x47e   : > { %v2148_v52 = vpop.eup %1497  ;;  %v736_v50 = vpop.xlane.xlu1 %735 }
 0x47f   : > { %1507 = vpow2.f32 %v819_v48  ;;  %v773_v55 = vsub.f32 %v2056_v12, %v736_v50  ;;  %v774_v58 = vsub.f32 %v2058_v13, %v736_v50  ;;  %v866_v9 = vadd.f32 %v2148_v52, %v2146_v7 }
 0x480   : > { %1509 = vpow2.f32 %v821_v49 }
 0x481   : > { %v2154_v10 = vpop.eup %1499  ;;  %v823_v2 = vmul.f32 1.442695, %v773_v55  ;;  %v825_v53 = vmul.f32 1.442695, %v774_v58  ;;  %867 = vadd.xlane.f32.xlu1 %v866_v9 }
 0x482   : > { %v2156_v54 = vpop.eup %1501  ;;  %v739_v5 = vpop.xlane.xlu1 %738 }
 0x483   : > { %1511 = vpow2.f32 %v823_v2  ;;  %v775_v57 = vsub.f32 %v2062_v15, %v739_v5  ;;  %v776_v8 = vsub.f32 %v2064_v16, %v739_v5  ;;  %v869_v12 = vadd.f32 %v2156_v54, %v2154_v10 }
 0x484   : > { %1513 = vpow2.f32 %v825_v53 }
 0x485   : > { %v2162_v13 = vpop.eup %1503  ;;  %v827_v14 = vmul.f32 1.442695, %v775_v57  ;;  %v829_v17 = vmul.f32 1.442695, %v776_v8  ;;  %870 = vadd.xlane.f32.xlu1 %v869_v12 }
 0x486   : > { %v2164_v20 = vpop.eup %1505  ;;  %v742_v59 = vpop.xlane.xlu1 %741 }
 0x487   : > { %1515 = vpow2.f32 %v827_v14  ;;  %v777_v23 = vsub.f32 %v2068_v18, %v742_v59  ;;  %v778_v26 = vsub.f32 %v2070_v19, %v742_v59  ;;  %v872_v15 = vadd.f32 %v2164_v20, %v2162_v13 }
 0x488   : > { %1517 = vpow2.f32 %v829_v17 }
 0x489   : > { %v2170_v16 = vpop.eup %1507  ;;  %v831_v33 = vmul.f32 1.442695, %v777_v23  ;;  %v833_v34 = vmul.f32 1.442695, %v778_v26  ;;  %873 = vadd.xlane.f32.xlu1 %v872_v15 }
 0x48a   : > { %v2172_v35 = vpop.eup %1509  ;;  %v745_v62 = vpop.xlane.xlu1 %744 }
 0x48b   : > { %1519 = vpow2.f32 %v831_v33  ;;  %v779_v36 = vsub.f32 %v2074_v21, %v745_v62  ;;  %v780_v37 = vsub.f32 %v2076_v22, %v745_v62  ;;  %v875_v18 = vadd.f32 %v2172_v35, %v2170_v16 }
 0x48c   : > { %1521 = vpow2.f32 %v833_v34  ;;  %v1323_v34 = vcombine.high %v1950_v0, %v1953_v1 }
 0x48d   : > { %v2178_v19 = vpop.eup %1511  ;;  %v835_v39 = vmul.f32 1.442695, %v779_v36  ;;  %v837_v40 = vmul.f32 1.442695, %v780_v37  ;;  %876 = vadd.xlane.f32.xlu1 %v875_v18 }
 0x48e   : > { %v2180_v41 = vpop.eup %1513  ;;  %v748_v3 = vpop.xlane.xlu1 %747  ;;  %1005 = vmatprep.mubr.bf16.mxu1 %v1323_v34 }
 0x48f   : > { %1523 = vpow2.f32 %v835_v39  ;;  %v781_v42 = vsub.f32 %v2080_v24, %v748_v3  ;;  %v782_v43 = vsub.f32 %v2082_v25, %v748_v3  ;;  %v878_v21 = vadd.f32 %v2180_v41, %v2178_v19 }
 0x490   : > { %1525 = vpow2.f32 %v837_v40 }
 0x491   : > { %v2186_v22 = vpop.eup %1515  ;;  %v839_v45 = vmul.f32 1.442695, %v781_v42  ;;  %v841_v46 = vmul.f32 1.442695, %v782_v43  ;;  %879 = vadd.xlane.f32.xlu1 %v878_v21 }
 0x492   : > { %v2188_v47 = vpop.eup %1517  ;;  %v751_v6 = vpop.xlane.xlu1 %750 }
 0x493   : > { %1527 = vpow2.f32 %v839_v45  ;;  %v783_v48 = vsub.f32 %v2086_v27, %v751_v6  ;;  %v784_v49 = vsub.f32 %v2088_v28, %v751_v6  ;;  %v881_v24 = vadd.f32 %v2188_v47, %v2186_v22 }
 0x494   : > { %1529 = vpow2.f32 %v841_v46 }
 0x495   : > { %v2194_v25 = vpop.eup %1519  ;;  %v843_v50 = vmul.f32 1.442695, %v783_v48  ;;  %v845_v55 = vmul.f32 1.442695, %v784_v49  ;;  %882 = vadd.xlane.f32.xlu1 %v881_v24 }
 0x496   : > { %v2196_v58 = vpop.eup %1521  ;;  %v754_v9 = vpop.xlane.xlu1 %753 }
 0x497   : > { %1531 = vpow2.f32 %v843_v50  ;;  %v785_v2 = vsub.f32 %v2092_v31, %v754_v9  ;;  %v786_v53 = vsub.f32 %v2094_v32, %v754_v9  ;;  %v884_v27 = vadd.f32 %v2196_v58, %v2194_v25 }
 0x498   : > { %1533 = vpow2.f32 %v845_v55 }
 0x499   : > { %v2202_v28 = vpop.eup %1523  ;;  %v847_v5 = vmul.f32 1.442695, %v785_v2  ;;  %v849_v57 = vmul.f32 1.442695, %v786_v53  ;;  %885 = vadd.xlane.f32.xlu1 %v884_v27 }
 0x49a   : > { %v2204_v8 = vpop.eup %1525 }
 0x49b   : > { %1535 = vpow2.f32 %v847_v5  ;;  %v887_v12 = vadd.f32 %v2204_v8, %v2202_v28 }
 0x49c   : > { %1537 = vpow2.f32 %v849_v57 }
 0x49d   : > { %v2208_v14 = vpop.eup %1527  ;;  %888 = vadd.xlane.f32.xlu1 %v887_v12 }
 0x49e   : > { %v2210_v31 = vpop.eup %1529 }
 0x49f   : > { %v890_v32 = vadd.f32 %v2210_v31, %v2208_v14 }
 0x4a1   : > { %v2214_v17 = vpop.eup %1531  ;;  %891 = vadd.xlane.f32.xlu0 %v890_v32 }
 0x4a2   : > { %v2216_v59 = vpop.eup %1533 }
 0x4a3   : > { %v893_v23 = vadd.f32 %v2216_v59, %v2214_v17 }
 0x4a5   : > { %v2220_v26 = vpop.eup %1535  ;;  %894 = vadd.xlane.f32.xlu1 %v893_v23 }
 0x4a6   : > { %v2222_v15 = vpop.eup %1537 }
 0x4a7   : > { %v896_v33 = vadd.f32 %v2222_v15, %v2220_v26 }
 0x4a9   : > { %897 = vadd.xlane.f32.xlu0 %v896_v33 }
 0x4fa   : > { %v853_v62 = vpop.xlane.xlu1 %852 }
 0x4fb   : > { %1539 = vrcp.f32 %v853_v62 }
 0x4fe   : > { %v856_v36 = vpop.xlane.xlu1 %855 }
 0x4ff   : > { %1541 = vrcp.f32 %v856_v36 }
 0x502   : > { %v859_v37 = vpop.xlane.xlu1 %858 }
 0x503   : > { %1543 = vrcp.f32 %v859_v37 }
 0x505   : > { %v1540_v39 = vpop.eup %1539 }
 0x506   : > { %v862_v18 = vpop.xlane.xlu1 %861  ;;  %v916_v42 = vmul.f32 %v1540_v39, %v2108_v61  ;;  %v915_v21 = vmul.f32 %v1540_v39, %v2106_v51 }
 0x507   : > { %1545 = vrcp.f32 %v862_v18 }
 0x509   : > { %v1542_v40 = vpop.eup %1541 }
 0x50a   : > { %v865_v3 = vpop.xlane.xlu1 %864  ;;  %v918_v43 = vmul.f32 %v1542_v40, %v2116_v11  ;;  %v917_v45 = vmul.f32 %v1542_v40, %v2114_v56 }
 0x50b   : > { %1547 = vrcp.f32 %v865_v3 }
 0x50c   : > { %v948_v46 = vpack.c.bf16 %v918_v43, %v916_v42  ;;  %v947_v6 = vpack.c.bf16 %v917_v45, %v915_v21 }
 0x50d   : > { %v1544_v49 = vpop.eup %1543 }
 0x50e   : > { %973 = vmatprep.subr.bf16.mxu1 %v948_v46  ;;  %v868_v48 = vpop.xlane.xlu1 %867  ;;  %v920_v55 = vmul.f32 %v1544_v49, %v2124_v29  ;;  %v919_v11 = vmul.f32 %v1544_v49, %v2122_v60 }
 0x50f   : > { %1549 = vrcp.f32 %v868_v48  ;;  %974 = vmatpush1.bf16.xpose.msra.mxu1 %v947_v6 }
 0x511   : > { %v1546_v24 = vpop.eup %1545 }
 0x512   : > { %v871_v50 = vpop.xlane.xlu1 %870  ;;  %v922_v61 = vmul.f32 %v1546_v24, %v2132_v38  ;;  %v921_v51 = vmul.f32 %v1546_v24, %v2130_v63 }
 0x513   : > { %1551 = vrcp.f32 %v871_v50 }
 0x514   : > { %v950_v9 = vpack.c.bf16 %v922_v61, %v920_v55  ;;  %v949_v56 = vpack.c.bf16 %v921_v51, %v919_v11 }
 0x515   : > { %v1548_v53 = vpop.eup %1547 }
 0x516   : > { %975 = vmatprep.subr.bf16.mxu1 %v950_v9  ;;  %v874_v2 = vpop.xlane.xlu1 %873  ;;  %v924_v57 = vmul.f32 %v1548_v53, %v2140_v44  ;;  %v923_v38 = vmul.f32 %v1548_v53, %v2138_v4 }
 0x517   : > { %1553 = vrcp.f32 %v874_v2  ;;  %976 = vmatpush1.bf16.xpose.msra.mxu1 %v949_v56 }
 0x519   : > { %v1550_v27 = vpop.eup %1549 }
 0x51a   : > { %v877_v5 = vpop.xlane.xlu1 %876  ;;  %v926_v29 = vmul.f32 %v1550_v27, %v2148_v52  ;;  %v925_v60 = vmul.f32 %v1550_v27, %v2146_v7 }
 0x51b   : > { %1555 = vrcp.f32 %v877_v5 }
 0x51c   : > { %v952_v12 = vpack.c.bf16 %v926_v29, %v924_v57  ;;  %v951_v63 = vpack.c.bf16 %v925_v60, %v923_v38  ;;  %v1474_v38 = vld [vmem:[%s2358_s3] sm:$0xff]  }
 0x51d   : > { %v1552_v23 = vpop.eup %1551 }
 0x51e   : > { %977 = vmatprep.subr.bf16.mxu1 %v952_v12  ;;  %v880_v32 = vpop.xlane.xlu1 %879  ;;  %v928_v62 = vmul.f32 %v1552_v23, %v2156_v54  ;;  %v927_v52 = vmul.f32 %v1552_v23, %v2154_v10  ;;  %v1140_v23 = vstv %s1938_s16  ;;  %s1332_s16 = sshll.u32 %s1165_s14, 7 }
 0x51f   : > { %1557 = vrcp.f32 %v880_v32  ;;  %978 = vmatpush1.bf16.xpose.msra.mxu1 %v951_v63  ;;  %s2286_s5 = scalar_lea.hbm %s2362_s7, %s1332_s16 }
 0x521   : > { %v1554_v33 = vpop.eup %1553 }
 0x522   : > { %v883_v34 = vpop.xlane.xlu1 %882  ;;  %v930_v44 = vmul.f32 %v1554_v33, %v2164_v20  ;;  %v929_v4 = vmul.f32 %v1554_v33, %v2162_v13 }
 0x523   : > { %1559 = vrcp.f32 %v883_v34 }
 0x524   : > { %v954_v36 = vpack.c.bf16 %v930_v44, %v928_v62  ;;  %v953_v7 = vpack.c.bf16 %v929_v4, %v927_v52  ;;  %v1137_v44 = vstv %s1936_s12 }
 0x525   : > { %v1556_v18 = vpop.eup %1555 }
 0x526   : > { %979 = vmatprep.subr.bf16.mxu1 %v954_v36  ;;  %v886_v37 = vpop.xlane.xlu1 %885  ;;  %v932_v3 = vmul.f32 %v1556_v18, %v2172_v35  ;;  %v931_v20 = vmul.f32 %v1556_v18, %v2170_v16 }
 0x527   : > { %1561 = vrcp.f32 %v886_v37  ;;  %980 = vmatpush1.bf16.xpose.msra.mxu1 %v953_v7 }
 0x529   : > { %v1558_v39 = vpop.eup %1557 }
 0x52a   : > { %v889_v40 = vpop.xlane.xlu1 %888  ;;  %v934_v54 = vmul.f32 %v1558_v39, %v2180_v41  ;;  %v933_v10 = vmul.f32 %v1558_v39, %v2178_v19 }
 0x52b   : > { %1563 = vrcp.f32 %v889_v40 }
 0x52c   : > { %v956_v42 = vpack.c.bf16 %v934_v54, %v932_v3  ;;  %v955_v13 = vpack.c.bf16 %v933_v10, %v931_v20 }
 0x52d   : > { %v1560_v21 = vpop.eup %1559 }
 0x52e   : > { %v892_v43 = vpop.xlane.xlu0 %891  ;;  %981 = vmatprep.subr.bf16.mxu1 %v956_v42  ;;  %v936_v6 = vmul.f32 %v1560_v21, %v2188_v47  ;;  %v935_v41 = vmul.f32 %v1560_v21, %v2186_v22 }
 0x52f   : > { %1565 = vrcp.f32 %v892_v43  ;;  %982 = vmatpush1.bf16.xpose.msra.mxu1 %v955_v13 }
 0x531   : > { %v1562_v45 = vpop.eup %1561 }
 0x532   : > { %v895_v46 = vpop.xlane.xlu1 %894  ;;  %v938_v35 = vmul.f32 %v1562_v45, %v2196_v58  ;;  %v937_v16 = vmul.f32 %v1562_v45, %v2194_v25 }
 0x533   : > { %1567 = vrcp.f32 %v895_v46 }
 0x534   : > { %v958_v48 = vpack.c.bf16 %v938_v35, %v936_v6  ;;  %v957_v19 = vpack.c.bf16 %v937_v16, %v935_v41 }
 0x535   : > { %v1564_v24 = vpop.eup %1563 }
 0x536   : > { %v898_v49 = vpop.xlane.xlu0 %897  ;;  %983 = vmatprep.subr.bf16.mxu1 %v958_v48  ;;  %v940_v55 = vmul.f32 %v1564_v24, %v2204_v8  ;;  %v939_v47 = vmul.f32 %v1564_v24, %v2202_v28 }
 0x537   : > { %1569 = vrcp.f32 %v898_v49  ;;  %984 = vmatpush1.bf16.xpose.msra.mxu1 %v957_v19 }
 0x539   : > { %v1566_v50 = vpop.eup %1565 }
 0x53a   : > { %v942_v61 = vmul.f32 %v1566_v50, %v2210_v31  ;;  %v941_v58 = vmul.f32 %v1566_v50, %v2208_v14  ;;  %v1322_v14 = vcombine.low %v1950_v0, %v1953_v1  ;;  %v1017_v0 = vld [vmem:[%s2359_s4] sm:$0xff]  ;;  %v1018_v1 = vld [vmem:[%s2359_s4 + $0x8] sm:$0xff] }
 0x53c   : > { %v960_v22 = vpack.c.bf16 %v942_v61, %v940_v55  ;;  %v959_v11 = vpack.c.bf16 %v941_v58, %v939_v47 }
 0x53d   : > { %v1568_v25 = vpop.eup %1567 }
 0x53e   : > { %985 = vmatprep.subr.bf16.mxu1 %v960_v22  ;;  %v944_v9 = vmul.f32 %v1568_v25, %v2216_v59  ;;  %v943_v8 = vmul.f32 %v1568_v25, %v2214_v17  ;;  %v1084_v59 = vld [vmem:[%s1083_s26] sm:$0xf] }
 0x53f   : > { %986 = vmatpush1.bf16.xpose.msra.mxu1 %v959_v11  ;;  %v1086_v17 = vld [vmem:[#allocation2] sm:$0xff]  ;;  %v1145_v34 = vunpack.c.l.bf16 %v1084_v59 }
 0x541   : > { %v1570_v51 = vpop.eup %1569  ;;  %v1147_v3 = vmul.f32 2.0, %v1145_v34 }
 0x542   : > { %v946_v56 = vmul.f32 %v1570_v51, %v2222_v15  ;;  %v945_v31 = vmul.f32 %v1570_v51, %v2220_v26  ;;  %v1085_v15 = vld [vmem:[%s1083_s26 + $0x8] sm:$0xf]  ;;  %v1730_v26 = vmov 0   ;;  %s1605_s26 = sshll.u32 %s1731_s6, 4  ;;  %s1606_s26 = int_to_ptr.vmem [resolvable:$false] %s1605_s26 }
 0x543   : > { %v1328_v53 = vcombine.low %v1084_v59, %v1085_v15  ;;  %1472 = vset.pattern.permute.xlu0 %v1730_v26  ;;  %1471 = vset.pattern.permute.xlu1 %v1730_v26  ;;  %v1146_v37 = vunpack.c.l.bf16 %v1085_v15  ;;  %s1607_s15 = scalar_lea.vmem %s1606_s26, 512  ;;  %p1608_p9 = scmp.lt.s32.totalorder %s2288_s11, %s1606_s26 }
 0x544   : > { %v962_v2 = vpack.c.bf16 %v946_v56, %v944_v9  ;;  %v961_v28 = vpack.c.bf16 %v945_v31, %v943_v8  ;;  %1021 = vperm.xlu1 %1471, %v1017_v0   ;;  %1026 = vperm.xlu0 %1472, %v1018_v1   ;;  %p1609_p3 = scmp.lt.s32.totalorder %s1607_s15, %s1601_s10 }
 0x545   : > { %v1148_v13 = vmul.f32 2.0, %v1146_v37 }
 0x546   : > { %987 = vmatprep.subr.bf16.mxu1 %v962_v2  ;;  %p1610_p11 = por %p1609_p3, %p1608_p9 }
 0x547   : > { %988 = vmatpush1.bf16.xpose.msra.mxu1 %v961_v28 }
 0x548   : > { %1347 = vmatprep.subr.bf16.mxu1 %v1728_v30  ;;  %p1611_p13 = pnand %p1610_p11, %p1604_p6 }
 0x54e   : > { %1006 = vmatmul.mubr.bf16.vlgmr.msra.gmra.mrb[0].mxu1 %v1322_v14 }
 0x54f   : > { %1348 = vmatpush3.bf16.msra.mxu1 %v1328_v53  ;;  %1349 = vmatprep.mubr.msk.bf16.mxu1 %vm1729_vm4, %v1728_v30 }
 0x556   : > { %1350 = vmatmul.mubr.msk.bf16.vlgmr.msra.gmra.mrb[4].mxu1 %vm1034_vm3, %v1086_v17 }
 0x5c3   : > { %v1022_v33 = vpop.permute.xlu1 %1021  ;;  %v1027_v52 = vpop.permute.xlu0 %1026 }
 0x621   : > { %v1007_v27 = vpop.f32.mrb[0].mxu1 }
 0x622   : > { %v1009_v30 = vpop.f32.mrb[1].mxu1 }
 0x623   : > { %v1010_v5 = vpop.f32.mrb[2].mxu1 }
 0x624   : > { %v1016_v57 = vpack.c.bf16 %v1010_v5, %v1007_v27  ;;  %v1012_v29 = vpop.f32.mrb[3].mxu1 }
 0x626   : > { %1342 = vmatpush3.bf16.msra.mxu0 %v1016_v57 }
 0x629   : > { %1344 = vmatmul.mubr.msk.bf16.vlgmr.msra.gmra.mrb[32].mxu0 %vm1034_vm3, %v1474_v38  ;;  %v1130_v60 = vpop.f32.mrb[4].mxu1 }
 0x62a   : > { %v1351_v12 = vpop.f32.mrb[5].mxu1  ;;  %v1141_v36 = vmul.f32 %v1140_v23, %v1130_v60 }
 0x62b   : > { %v1133_v63 = vpop.f32.mrb[6].mxu1 }
 0x62c   : > { %v1352_v32 = vpop.f32.mrb[7].mxu1  ;;  %v1142_v42 = vmul.f32 %v1140_v23, %v1133_v63 }
 0x6fc   : > { %v1072_v62 = vpop.f32.mrb[32].mxu0 }
 0x6fd   : > { %v1345_v4 = vpop.f32.mrb[33].mxu0  ;;  %v1073_v7 = vadd.f32 %v1072_v62, %v1022_v33 }
 0x6fe   : > { %v1075_v18 = vpop.f32.mrb[34].mxu0 }
 0x6ff   : > { %v1076_v39 = vadd.f32 %v1075_v18, %v1027_v52  ;;  %v1346_v40 = vpop.f32.mrb[35].mxu0  ;;  %v1138_v54 = vmul.f32 %v1137_v44, %v1073_v7 }
 0x701   : > { %v1139_v20 = vmul.f32 %v1137_v44, %v1076_v39  ;;  %v1143_v10 = vadd.f32 %v1141_v36, %v1138_v54 }
 0x703   : > { %v1149_v43 = vadd.f32 %v1147_v3, %v1143_v10  ;;  %v1144_v21 = vadd.f32 %v1142_v42, %v1139_v20 }
 0x705   : > { %1151 = vst [vmem:[%s1957_s21] sm:$0xff] %v1149_v43  ;;  %v1150_v45 = vadd.f32 %v1148_v13, %v1144_v21 }
 0x707   : > { %1152 = vst [vmem:[%s1957_s21 + $0x8] sm:$0xff] %v1150_v45 }
 0x708   : > { %1614 = shalt.err (!%p1611_p13)
}
 0x709   : > { %s1615_s0 = scalar_lea.hbm %s2286_s5, 256  ;;  %s1619_s17 = scalar_lea.hbm %s2362_s7, 1024 }
 0x70a   : > { %p1616_p5 = scmp.ne.s32.totalorder %s2286_s5, %s1615_s0  ;;  %p1620_p12 = scmp.lt.u32.totalorder %s2286_s5, %s2362_s7 }
 0x70b   : > { %p1621_p2 = scmp.lt.u32.totalorder %s1619_s17, %s1615_s0  ;;  %p1623_p4 = scmp.lt.u32.totalorder %s1615_s0, %s2286_s5 }
 0x70c   : > { %p1617_p8 = pnand %p1616_p5, %p2385_p0 }
 0x70d   : > { %p1622_p7 = por %p1621_p2, %p1620_p12 }
 0x70e   : > { %p1618_p10 = pneg %p1617_p8 }
 0x70f   : > { %p1624_p1 = por %p1623_p4, %p1622_p7 }
 0x711   : > { %p1625_p6 = pnand %p1624_p1, %p1618_p10 }
 0x713   : > { %1628 = shalt.err (!%p1625_p6)
}
 0x714   : > { %s1732_s19 = smov 128   ;;  %s1733_s18 = smov 256  }
 0x715   : > { %s1734_s14 = smov 8  }
 0x716   : > { %1355 = dma.vmem_to_hbm [thread:$0]  (%p2385_p0), %s2288_s11, 256, %s2286_s5, %s2294_s9, %s1732_s19, %s1733_s18, %s1734_s14  }
 0x717 PF: > { %p1366_p9 = scmp.ge.s32.totalorder %s1723_s13, 2  ;;  %s1183_s16 = sand.u32 1, %s1683_s28  }
 0x718   : > { %p2386_p3 = scmp.ne.s32.totalorder %s2381_s8, 0  ;;  %s1184_s12 = scalar_lea.sflag [#allocation7], %s1183_s16 }
 0x71a   : > { %p1362_p11 = pnand %p1366_p9, %p2386_p3 }
 0x71c   : > { %1678 = dma.done.wait (!%p1362_p11), %s1184_s12, 256  }
 0x71d   : > { %1680 = vsyncadd (!%p1362_p11), %s1184_s12, 4294967040  ;;  %s25_s13 = sadd.s32 1, %s1723_s13   ;;  %s2387_s8 = sld [smem:[#allocation11_spill]] }
 0x71e   : > { %p22_p13 = scmp.ge.s32.totalorder %s25_s13, 6   ;;  %s2388_s9 = sld [smem:[#allocation12_spill]] }
 0x71f   : > { %s2389_s10 = sld [smem:[#allocation17_spill]]  ;;  %s2390_s5 = sld [smem:[#allocation13_spill]] }
 0x720   : > { %s2391_s11 = sld [smem:[#allocation14_spill]]  ;;  %s2392_s6 = sld [smem:[#allocation15_spill]] }
 0x721   : > { %s2393_s12 = sld [smem:[#allocation16_spill]]  ;;  %s2394_s28 = smov %s1687_s29 }
 0x722   : > { %s2395_s29 = smov %s1691_s30  ;;  %s2396_s30 = smov %s1871_s27 }
 0x723   :  { %24 = sbr.rel (!%p22_p13) target bundleno = 13 (0xd), region = 104 }
 0x72a   :  { %1189 = vsyncpa [#allocation6], 1 }
 0x72b   :  { %1191 = vsyncpa [#allocation6 + $0x1], 1 }
 0x72c   :  { %1192 = vsyncpa [#allocation7], 1 }
 0x72d   :  { %1194 = vsyncpa [#allocation7 + $0x1], 1 }

</bundles_post_ra>
